<compile_context>
chip_gen: v5e
topology: v5e:2x2
jax: 0.10.0
libtpu: 0.0.40
codegen_flags: <defaults>
</compile_context>

<pallas_src>
import functools

import jax
import jax.numpy as jnp
from jax.experimental import pallas as pl
from jax.experimental.pallas import tpu as pltpu


# ---------------------------------------------------------------------------
# helpers
# ---------------------------------------------------------------------------
def _tap_offsets(padded_w):
    """Flattened-spatial offsets of the 9 taps of a 3x3 conv on a (H+2, W+2) grid."""
    return tuple((kh - 1) * padded_w + (kw - 1) for kh in range(3) for kw in range(3))


# ---------------------------------------------------------------------------
# fused kernel: conv_1 (3x3) + half instance norm + ReLU + conv_2 (3x3) + ReLU
#               + identity (1x1) + add, per image
# ---------------------------------------------------------------------------
def _hin_fused_kernel(xp_ref, valid_ref, w1_ref, b1_ref, g_ref, bt_ref,
                      w2_ref, b2_ref, wid_ref, bid_ref, o_ref,
                      *, h, w, eps, compute_dtype):
    cout = o_ref.shape[1]
    c1 = cout // 2
    mp = xp_ref.shape[-1]                 # lane-padded flattened spatial size
    taps = _tap_offsets(w + 2)

    xp = xp_ref[0]                        # (Cin, Mp), zero padding ring + zero tail
    valid = valid_ref[...]                # (1, Mp): 1.0 on the H*W interior

    def conv3x3(src, w_ref):
        # 9 lane rotations (XLU) stacked along K -> one MXU matmul with K = 9*Csrc.
        # Wrap-around of the rolls only ever lands on padding-ring / tail output
        # positions, which are masked (acc1) or sliced away by the caller (output).
        src = src.astype(compute_dtype)
        rolled = [src if ((-d) % mp) == 0
                  else pltpu.roll(src, shift=(-d) % mp, axis=src.ndim - 1)
                  for d in taps]
        stacked = jnp.concatenate(rolled, axis=0)          # (9*Csrc, Mp)
        return jnp.dot(w_ref[...], stacked, preferred_element_type=jnp.float32)

    # ---- conv_1 + bias; zero the padding ring and the lane tail ---------------
    acc1 = (conv3x3(xp, w1_ref) + b1_ref[...]) * valid      # (Cout, Mp) f32

    # ---- half instance norm (two-pass stats over the H*W interior) ------------
    inv_cnt = 1.0 / float(h * w)
    mean = jnp.sum(acc1, axis=1, keepdims=True) * inv_cnt            # (Cout, 1)
    cen = (acc1 - mean) * valid
    var = jnp.sum(cen * cen, axis=1, keepdims=True) * inv_cnt
    normed = cen * jax.lax.rsqrt(var + eps) * g_ref[...] + bt_ref[...]
    ch = jax.lax.broadcasted_iota(jnp.int32, (cout, 1), 0)
    hin = jnp.where(ch < c1, normed, acc1)                  # first half normalized
    a = jnp.maximum(hin, 0.0) * valid                       # ReLU; ring/tail stay 0

    # ---- relu(conv_2(a)) + identity(x) ----------------------------------------
    conv2 = jnp.maximum(conv3x3(a, w2_ref) + b2_ref[...], 0.0)
    ident = jnp.dot(wid_ref[...], xp.astype(compute_dtype),
                    preferred_element_type=jnp.float32) + bid_ref[...]
    # NOTE: the padding ring / lane tail of this output contains garbage; the
    # wrapper slices it away.  Do not consume the padded output directly.
    o_ref[0] = (conv2 + ident).astype(o_ref.dtype)


# ---------------------------------------------------------------------------
# wrapper
# ---------------------------------------------------------------------------
def hin_forward(x_nchw, params, *, compute_dtype=jnp.float32):
    """Pallas implementation of HIN.forward.  Input/output: NCHW float32."""
    w1, b1, gamma, beta, w2, b2, wid, bid = params
    n, cin, h, w = x_nchw.shape
    cout = w1.shape[-1]
    assert cout % 2 == 0, "HIN requires an even number of output channels"
    assert h >= 1 and w >= 1          # roll wrap-around never reaches the interior
    c1 = cout // 2
    f32 = jnp.float32

    mp = (h + 2) * (w + 2)
    mp_pad = ((mp + 127) // 128) * 128        # lane-dense stores (multiple of 128)

    # Zero-pad H/W by 1, flatten spatial, pad the lane axis up to mp_pad.
    xp = jnp.pad(x_nchw.astype(f32),
                 ((0, 0), (0, 0), (1, 1), (1, 1))).reshape(n, cin, mp)
    xp = jnp.pad(xp, ((0, 0), (0, 0), (0, mp_pad - mp))).astype(compute_dtype)

    # Interior mask, computed once (kept resident via constant index_map).
    col = jnp.arange(mp_pad, dtype=jnp.int32)
    rr, cc = col // (w + 2), col % (w + 2)
    valid = (((col < mp) & (rr >= 1) & (rr <= h) & (cc >= 1) & (cc <= w))
             .astype(f32).reshape(1, mp_pad))

    # Stacked tap-major weights: (Cout, 9*Cin) / (Cout, 9*Cout); identity (Cout, Cin).
    w1s = jnp.transpose(w1, (3, 0, 1, 2)).reshape(cout, 9 * cin).astype(compute_dtype)
    w2s = jnp.transpose(w2, (3, 0, 1, 2)).reshape(cout, 9 * cout).astype(compute_dtype)
    widt = jnp.transpose(wid, (1, 0)).astype(compute_dtype)
    b1c = b1.reshape(cout, 1).astype(f32)
    b2c = b2.reshape(cout, 1).astype(f32)
    bidc = bid.reshape(cout, 1).astype(f32)
    # affine params extended to all channels (second half discarded in-kernel)
    g_ext = jnp.concatenate([gamma.astype(f32),
                             jnp.ones((cout - c1,), f32)]).reshape(cout, 1)
    bt_ext = jnp.concatenate([beta.astype(f32),
                              jnp.zeros((cout - c1,), f32)]).reshape(cout, 1)

    def rep(shape):      # whole-array operand, same block for every grid step
        nd = len(shape)
        return pl.BlockSpec(shape, lambda i: (0,) * nd)

    wbytes = jnp.dtype(compute_dtype).itemsize
    cost = pl.CostEstimate(
        flops=2 * n * cout * (9 * cin + 9 * cout + cin) * mp_pad,
        transcendentals=n * cout,
        bytes_accessed=(n * mp_pad * (cin * wbytes + cout * 4)          # act in/out
                        + (9 * cin + 9 * cout + cin) * cout * wbytes    # weights
                        + 4 * (4 * cout + mp_pad)))                     # biases+mask

    y = pl.pallas_call(
        functools.partial(_hin_fused_kernel, h=h, w=w, eps=1e-5,
                          compute_dtype=compute_dtype),
        out_shape=jax.ShapeDtypeStruct((n, cout, mp_pad), f32),
        grid=(n,),
        in_specs=[
            pl.BlockSpec((1, cin, mp_pad), lambda i: (i, 0, 0)),
            rep((1, mp_pad)),
            rep((cout, 9 * cin)), rep((cout, 1)), rep((cout, 1)), rep((cout, 1)),
            rep((cout, 9 * cout)), rep((cout, 1)),
            rep((cout, cin)), rep((cout, 1)),
        ],
        out_specs=pl.BlockSpec((1, cout, mp_pad), lambda i: (i, 0, 0)),
        compiler_params=pltpu.CompilerParams(
            dimension_semantics=("parallel",),
            vmem_limit_bytes=32 * 1024 * 1024),
        cost_estimate=cost,
    )(xp, valid, w1s, b1c, g_ext, bt_ext, w2s, b2c, widt, bidc)

    # Drop the lane tail and the padding ring (reshape is free; slice is one pass).
    return y[:, :, :mp].reshape(n, cout, h + 2, w + 2)[:, :, 1:h + 1, 1:w + 1]


# ---------------------------------------------------------------------------
# Pure-JAX reference (for correctness check)
# ---------------------------------------------------------------------------
def hin_reference(x, params):
    w1, b1, gamma, beta, w2, b2, wid, bid = params
    dn = ('NCHW', 'HWIO', 'NCHW')

    def conv(inp, wt, pad):
        return jax.lax.conv_general_dilated(
            inp, wt, (1, 1), pad, dimension_numbers=dn,
            precision=jax.lax.Precision.HIGHEST)

    out = conv(x, w1, ((1, 1), (1, 1))) + b1[None, :, None, None]
    c1 = out.shape[1] // 2
    o1, o2 = out[:, :c1], out[:, c1:]
    mean = o1.mean(axis=(2, 3), keepdims=True)
    var = ((o1 - mean) ** 2).mean(axis=(2, 3), keepdims=True)
    o1n = (o1 - mean) / jnp.sqrt(var + 1e-5)
    o1n = o1n * gamma[None, :, None, None] + beta[None, :, None, None]
    out = jnp.maximum(jnp.concatenate([o1n, o2], axis=1), 0.0)
    out = jnp.maximum(conv(out, w2, ((1, 1), (1, 1)))
                      + b2[None, :, None, None], 0.0)
    ident = (conv(x, wid.reshape(1, 1, *wid.shape), ((0, 0), (0, 0)))
             + bid[None, :, None, None])
    return ident + out


# ---------------------------------------------------------------------------
if __name__ == "__main__":
    key = jax.random.PRNGKey(0)
    ks = jax.random.split(key, 8)

    N, Cin, Cout, H, W = 2, 4, 8, 16, 16

    # Deterministic synthetic parameters (HWIO layout for conv weights).
    w1 = jax.random.normal(ks[0], (3, 3, Cin, Cout), jnp.float32) * 0.1
    b1 = jax.random.normal(ks[1], (Cout,), jnp.float32) * 0.1
    gamma = jnp.ones((Cout // 2,), jnp.float32)       # InstanceNorm2d affine init
    beta = jnp.zeros((Cout // 2,), jnp.float32)
    w2 = jax.random.normal(ks[2], (3, 3, Cout, Cout), jnp.float32) * 0.1
    b2 = jax.random.normal(ks[3], (Cout,), jnp.float32) * 0.1
    wid = jax.random.normal(ks[4], (Cin, Cout), jnp.float32) * 0.1    # 1x1 conv
    bid = jax.random.normal(ks[5], (Cout,), jnp.float32) * 0.1
    params = (w1, b1, gamma, beta, w2, b2, wid, bid)

    x = jax.random.normal(ks[6], (N, Cin, H, W), jnp.float32)

    y = jax.block_until_ready(jax.jit(hin_forward)(x, params))
    y_ref = hin_reference(x, params)

    assert y.shape == (N, Cout, H, W), y.shape
    assert jnp.allclose(y, y_ref, atol=5e-3, rtol=5e-3), \
        float(jnp.max(jnp.abs(y - y_ref)))
    print("KERNEL_OK")
</pallas_src>

<mosaic_0001>
module attributes {stable_mosaic.version = 11 : i64} {
  func.func @_hin_fused_kernel(%arg0: i32, %arg1: memref<1x4x384xf32, #tpu.memory_space<vmem>>, %arg2: memref<1x384xf32, #tpu.memory_space<vmem>>, %arg3: memref<8x36xf32, #tpu.memory_space<vmem>>, %arg4: memref<8x1xf32, #tpu.memory_space<vmem>>, %arg5: memref<8x1xf32, #tpu.memory_space<vmem>>, %arg6: memref<8x1xf32, #tpu.memory_space<vmem>>, %arg7: memref<8x72xf32, #tpu.memory_space<vmem>>, %arg8: memref<8x1xf32, #tpu.memory_space<vmem>>, %arg9: memref<8x4xf32, #tpu.memory_space<vmem>>, %arg10: memref<8x1xf32, #tpu.memory_space<vmem>>, %arg11: memref<1x8x384xf32, #tpu.memory_space<vmem>>) attributes {dimension_semantics = [#tpu.dimension_semantics<parallel>], iteration_bounds = array<i64: 2>, scalar_prefetch = 0 : i64, scratch_operands = 0 : i64, tpu.core_type = #tpu.core_type<tc>, window_params = [{transform_indices = @transform_0, window_bounds = array<i64: 1, 4, 384>}, {pipeline_mode = #tpu.pipeline_mode<synchronous>, transform_indices = @transform_1, window_bounds = array<i64: 1, 384>}, {pipeline_mode = #tpu.pipeline_mode<synchronous>, transform_indices = @transform_2, window_bounds = array<i64: 8, 36>}, {pipeline_mode = #tpu.pipeline_mode<synchronous>, transform_indices = @transform_3, window_bounds = array<i64: 8, 1>}, {pipeline_mode = #tpu.pipeline_mode<synchronous>, transform_indices = @transform_4, window_bounds = array<i64: 8, 1>}, {pipeline_mode = #tpu.pipeline_mode<synchronous>, transform_indices = @transform_5, window_bounds = array<i64: 8, 1>}, {pipeline_mode = #tpu.pipeline_mode<synchronous>, transform_indices = @transform_6, window_bounds = array<i64: 8, 72>}, {pipeline_mode = #tpu.pipeline_mode<synchronous>, transform_indices = @transform_7, window_bounds = array<i64: 8, 1>}, {pipeline_mode = #tpu.pipeline_mode<synchronous>, transform_indices = @transform_8, window_bounds = array<i64: 8, 4>}, {pipeline_mode = #tpu.pipeline_mode<synchronous>, transform_indices = @transform_9, window_bounds = array<i64: 8, 1>}, {transform_indices = @transform_10, window_bounds = array<i64: 1, 8, 384>}]} {
    %c0 = arith.constant 0 : index
    %c0_0 = arith.constant 0 : index
    %c0_1 = arith.constant 0 : index
    %0 = vector.load %arg1[%c0, %c0_0, %c0_1] : memref<1x4x384xf32, #tpu.memory_space<vmem>>, vector<1x4x384xf32>
    %1 = vector.shape_cast %0 : vector<1x4x384xf32> to vector<4x384xf32>
    %c0_2 = arith.constant 0 : index
    %c0_3 = arith.constant 0 : index
    %2 = vector.load %arg2[%c0_2, %c0_3] : memref<1x384xf32, #tpu.memory_space<vmem>>, vector<1x384xf32>
    %c19_i32 = arith.constant 19 : i32
    %3 = tpu.dynamic_rotate %1 by %c19_i32 dim 1 : vector<4x384xf32>, i32 -> vector<4x384xf32>
    %c18_i32 = arith.constant 18 : i32
    %4 = tpu.dynamic_rotate %1 by %c18_i32 dim 1 : vector<4x384xf32>, i32 -> vector<4x384xf32>
    %c17_i32 = arith.constant 17 : i32
    %5 = tpu.dynamic_rotate %1 by %c17_i32 dim 1 : vector<4x384xf32>, i32 -> vector<4x384xf32>
    %c1_i32 = arith.constant 1 : i32
    %6 = tpu.dynamic_rotate %1 by %c1_i32 dim 1 : vector<4x384xf32>, i32 -> vector<4x384xf32>
    %c383_i32 = arith.constant 383 : i32
    %7 = tpu.dynamic_rotate %1 by %c383_i32 dim 1 : vector<4x384xf32>, i32 -> vector<4x384xf32>
    %c367_i32 = arith.constant 367 : i32
    %8 = tpu.dynamic_rotate %1 by %c367_i32 dim 1 : vector<4x384xf32>, i32 -> vector<4x384xf32>
    %c366_i32 = arith.constant 366 : i32
    %9 = tpu.dynamic_rotate %1 by %c366_i32 dim 1 : vector<4x384xf32>, i32 -> vector<4x384xf32>
    %c365_i32 = arith.constant 365 : i32
    %10 = tpu.dynamic_rotate %1 by %c365_i32 dim 1 : vector<4x384xf32>, i32 -> vector<4x384xf32>
    %11 = tpu.concatenate %3, %4, %5, %6, %1, %7, %8, %9, %10 in 0 : vector<4x384xf32>, vector<4x384xf32>, vector<4x384xf32>, vector<4x384xf32>, vector<4x384xf32>, vector<4x384xf32>, vector<4x384xf32>, vector<4x384xf32>, vector<4x384xf32> -> vector<36x384xf32>
    %c0_4 = arith.constant 0 : index
    %c0_5 = arith.constant 0 : index
    %12 = vector.load %arg3[%c0_4, %c0_5] : memref<8x36xf32, #tpu.memory_space<vmem>>, vector<8x36xf32>
    %cst = arith.constant dense<0.000000e+00> : vector<8x384xf32>
    %13 = tpu.matmul %12, %11, %cst {dimension_numbers = #tpu.dot_dimension_numbers<[1], [0], [0], [1], [0, 0, 1, 1], [], []>} : vector<8x36xf32>, vector<36x384xf32>, vector<8x384xf32> -> vector<8x384xf32>
    %c0_6 = arith.constant 0 : index
    %c0_7 = arith.constant 0 : index
    %14 = vector.load %arg4[%c0_6, %c0_7] : memref<8x1xf32, #tpu.memory_space<vmem>>, vector<8x1xf32>
    %15 = vector.broadcast %14 : vector<8x1xf32> to vector<8x384xf32>
    %16 = arith.addf %13, %15 : vector<8x384xf32>
    %17 = vector.broadcast %2 : vector<1x384xf32> to vector<8x384xf32>
    %18 = arith.mulf %16, %17 : vector<8x384xf32>
    %cst_8 = arith.constant dense<0.000000e+00> : vector<8xf32>
    %19 = vector.multi_reduction <add>, %18, %cst_8 [1] : vector<8x384xf32> to vector<8xf32>
    %20 = vector.shape_cast %19 : vector<8xf32> to vector<8x1xf32>
    %cst_9 = arith.constant 3.906250e-03 : f32
    %21 = vector.broadcast %cst_9 : f32 to vector<8x1xf32>
    %22 = arith.mulf %20, %21 : vector<8x1xf32>
    %23 = vector.broadcast %22 : vector<8x1xf32> to vector<8x384xf32>
    %24 = arith.subf %18, %23 : vector<8x384xf32>
    %25 = vector.broadcast %2 : vector<1x384xf32> to vector<8x384xf32>
    %26 = arith.mulf %24, %25 : vector<8x384xf32>
    %27 = arith.mulf %26, %26 : vector<8x384xf32>
    %cst_10 = arith.constant dense<0.000000e+00> : vector<8xf32>
    %28 = vector.multi_reduction <add>, %27, %cst_10 [1] : vector<8x384xf32> to vector<8xf32>
    %29 = vector.shape_cast %28 : vector<8xf32> to vector<8x1xf32>
    %cst_11 = arith.constant 3.906250e-03 : f32
    %30 = vector.broadcast %cst_11 : f32 to vector<8x1xf32>
    %31 = arith.mulf %29, %30 : vector<8x1xf32>
    %cst_12 = arith.constant 9.99999974E-6 : f32
    %32 = vector.broadcast %cst_12 : f32 to vector<8x1xf32>
    %33 = arith.addf %31, %32 : vector<8x1xf32>
    %34 = math.rsqrt %33 : vector<8x1xf32>
    %35 = vector.broadcast %34 : vector<8x1xf32> to vector<8x384xf32>
    %36 = arith.mulf %26, %35 : vector<8x384xf32>
    %c0_13 = arith.constant 0 : index
    %c0_14 = arith.constant 0 : index
    %37 = vector.load %arg5[%c0_13, %c0_14] : memref<8x1xf32, #tpu.memory_space<vmem>>, vector<8x1xf32>
    %38 = vector.broadcast %37 : vector<8x1xf32> to vector<8x384xf32>
    %39 = arith.mulf %36, %38 : vector<8x384xf32>
    %c0_15 = arith.constant 0 : index
    %c0_16 = arith.constant 0 : index
    %40 = vector.load %arg6[%c0_15, %c0_16] : memref<8x1xf32, #tpu.memory_space<vmem>>, vector<8x1xf32>
    %41 = vector.broadcast %40 : vector<8x1xf32> to vector<8x384xf32>
    %42 = arith.addf %39, %41 : vector<8x384xf32>
    %43 = tpu.iota {dimensions = array<i32: 0>} : vector<8x1xi32>
    %c4_i32 = arith.constant 4 : i32
    %44 = vector.broadcast %c4_i32 : i32 to vector<8x1xi32>
    %45 = arith.cmpi slt, %43, %44 : vector<8x1xi32>
    %46 = vector.shape_cast %45 : vector<8x1xi1> to vector<8x1xi1>
    %47 = vector.broadcast %46 : vector<8x1xi1> to vector<8x384xi1>
    %48 = arith.select %47, %42, %18 : vector<8x384xi1>, vector<8x384xf32>
    %cst_17 = arith.constant 0.000000e+00 : f32
    %49 = vector.broadcast %cst_17 : f32 to vector<8x384xf32>
    %50 = arith.maximumf %48, %49 : vector<8x384xf32>
    %51 = vector.broadcast %2 : vector<1x384xf32> to vector<8x384xf32>
    %52 = arith.mulf %50, %51 : vector<8x384xf32>
    %c19_i32_18 = arith.constant 19 : i32
    %53 = tpu.dynamic_rotate %52 by %c19_i32_18 dim 1 : vector<8x384xf32>, i32 -> vector<8x384xf32>
    %c18_i32_19 = arith.constant 18 : i32
    %54 = tpu.dynamic_rotate %52 by %c18_i32_19 dim 1 : vector<8x384xf32>, i32 -> vector<8x384xf32>
    %c17_i32_20 = arith.constant 17 : i32
    %55 = tpu.dynamic_rotate %52 by %c17_i32_20 dim 1 : vector<8x384xf32>, i32 -> vector<8x384xf32>
    %c1_i32_21 = arith.constant 1 : i32
    %56 = tpu.dynamic_rotate %52 by %c1_i32_21 dim 1 : vector<8x384xf32>, i32 -> vector<8x384xf32>
    %c383_i32_22 = arith.constant 383 : i32
    %57 = tpu.dynamic_rotate %52 by %c383_i32_22 dim 1 : vector<8x384xf32>, i32 -> vector<8x384xf32>
    %c367_i32_23 = arith.constant 367 : i32
    %58 = tpu.dynamic_rotate %52 by %c367_i32_23 dim 1 : vector<8x384xf32>, i32 -> vector<8x384xf32>
    %c366_i32_24 = arith.constant 366 : i32
    %59 = tpu.dynamic_rotate %52 by %c366_i32_24 dim 1 : vector<8x384xf32>, i32 -> vector<8x384xf32>
    %c365_i32_25 = arith.constant 365 : i32
    %60 = tpu.dynamic_rotate %52 by %c365_i32_25 dim 1 : vector<8x384xf32>, i32 -> vector<8x384xf32>
    %61 = tpu.concatenate %53, %54, %55, %56, %52, %57, %58, %59, %60 in 0 : vector<8x384xf32>, vector<8x384xf32>, vector<8x384xf32>, vector<8x384xf32>, vector<8x384xf32>, vector<8x384xf32>, vector<8x384xf32>, vector<8x384xf32>, vector<8x384xf32> -> vector<72x384xf32>
    %c0_26 = arith.constant 0 : index
    %c0_27 = arith.constant 0 : index
    %62 = vector.load %arg7[%c0_26, %c0_27] : memref<8x72xf32, #tpu.memory_space<vmem>>, vector<8x72xf32>
    %cst_28 = arith.constant dense<0.000000e+00> : vector<8x384xf32>
    %63 = tpu.matmul %62, %61, %cst_28 {dimension_numbers = #tpu.dot_dimension_numbers<[1], [0], [0], [1], [0, 0, 1, 1], [], []>} : vector<8x72xf32>, vector<72x384xf32>, vector<8x384xf32> -> vector<8x384xf32>
    %c0_29 = arith.constant 0 : index
    %c0_30 = arith.constant 0 : index
    %64 = vector.load %arg8[%c0_29, %c0_30] : memref<8x1xf32, #tpu.memory_space<vmem>>, vector<8x1xf32>
    %65 = vector.broadcast %64 : vector<8x1xf32> to vector<8x384xf32>
    %66 = arith.addf %63, %65 : vector<8x384xf32>
    %cst_31 = arith.constant 0.000000e+00 : f32
    %67 = vector.broadcast %cst_31 : f32 to vector<8x384xf32>
    %68 = arith.maximumf %66, %67 : vector<8x384xf32>
    %c0_32 = arith.constant 0 : index
    %c0_33 = arith.constant 0 : index
    %69 = vector.load %arg9[%c0_32, %c0_33] : memref<8x4xf32, #tpu.memory_space<vmem>>, vector<8x4xf32>
    %cst_34 = arith.constant dense<0.000000e+00> : vector<8x384xf32>
    %70 = tpu.matmul %69, %1, %cst_34 {dimension_numbers = #tpu.dot_dimension_numbers<[1], [0], [0], [1], [0, 0, 1, 1], [], []>} : vector<8x4xf32>, vector<4x384xf32>, vector<8x384xf32> -> vector<8x384xf32>
    %c0_35 = arith.constant 0 : index
    %c0_36 = arith.constant 0 : index
    %71 = vector.load %arg10[%c0_35, %c0_36] : memref<8x1xf32, #tpu.memory_space<vmem>>, vector<8x1xf32>
    %72 = vector.broadcast %71 : vector<8x1xf32> to vector<8x384xf32>
    %73 = arith.addf %70, %72 : vector<8x384xf32>
    %74 = arith.addf %68, %73 : vector<8x384xf32>
    %c0_37 = arith.constant 0 : index
    %c0_38 = arith.constant 0 : index
    %c0_39 = arith.constant 0 : index
    %75 = vector.load %arg11[%c0_37, %c0_38, %c0_39] : memref<1x8x384xf32, #tpu.memory_space<vmem>>, vector<1x8x384xf32>
    %76 = vector.shape_cast %75 : vector<1x8x384xf32> to vector<8x384xf32>
    %77 = vector.shape_cast %74 : vector<8x384xf32> to vector<1x8x384xf32>
    tpu.vector_store %arg11[%c0_37, %c0_38, %c0_39], %77 {strides = array<i32>} : memref<1x8x384xf32, #tpu.memory_space<vmem>>, vector<1x8x384xf32>,
    return
  }
  func.func @transform_0(%arg0: i32) -> (i32, i32, i32) {
    %c0_i32 = arith.constant 0 : i32
    %c0_i32_0 = arith.constant 0 : i32
    %c0_i32_1 = arith.constant 0 : i32
    return %arg0, %c0_i32, %c0_i32_0 : i32, i32, i32
  }
  func.func @transform_1(%arg0: i32) -> (i32, i32) {
    %c0_i32 = arith.constant 0 : i32
    %c0_i32_0 = arith.constant 0 : i32
    %c0_i32_1 = arith.constant 0 : i32
    return %c0_i32, %c0_i32_0 : i32, i32
  }
  func.func @transform_2(%arg0: i32) -> (i32, i32) {
    %c0_i32 = arith.constant 0 : i32
    %c0_i32_0 = arith.constant 0 : i32
    %c0_i32_1 = arith.constant 0 : i32
    return %c0_i32, %c0_i32_0 : i32, i32
  }
  func.func @transform_3(%arg0: i32) -> (i32, i32) {
    %c0_i32 = arith.constant 0 : i32
    %c0_i32_0 = arith.constant 0 : i32
    %c0_i32_1 = arith.constant 0 : i32
    return %c0_i32, %c0_i32_0 : i32, i32
  }
  func.func @transform_4(%arg0: i32) -> (i32, i32) {
    %c0_i32 = arith.constant 0 : i32
    %c0_i32_0 = arith.constant 0 : i32
    %c0_i32_1 = arith.constant 0 : i32
    return %c0_i32, %c0_i32_0 : i32, i32
  }
  func.func @transform_5(%arg0: i32) -> (i32, i32) {
    %c0_i32 = arith.constant 0 : i32
    %c0_i32_0 = arith.constant 0 : i32
    %c0_i32_1 = arith.constant 0 : i32
    return %c0_i32, %c0_i32_0 : i32, i32
  }
  func.func @transform_6(%arg0: i32) -> (i32, i32) {
    %c0_i32 = arith.constant 0 : i32
    %c0_i32_0 = arith.constant 0 : i32
    %c0_i32_1 = arith.constant 0 : i32
    return %c0_i32, %c0_i32_0 : i32, i32
  }
  func.func @transform_7(%arg0: i32) -> (i32, i32) {
    %c0_i32 = arith.constant 0 : i32
    %c0_i32_0 = arith.constant 0 : i32
    %c0_i32_1 = arith.constant 0 : i32
    return %c0_i32, %c0_i32_0 : i32, i32
  }
  func.func @transform_8(%arg0: i32) -> (i32, i32) {
    %c0_i32 = arith.constant 0 : i32
    %c0_i32_0 = arith.constant 0 : i32
    %c0_i32_1 = arith.constant 0 : i32
    return %c0_i32, %c0_i32_0 : i32, i32
  }
  func.func @transform_9(%arg0: i32) -> (i32, i32) {
    %c0_i32 = arith.constant 0 : i32
    %c0_i32_0 = arith.constant 0 : i32
    %c0_i32_1 = arith.constant 0 : i32
    return %c0_i32, %c0_i32_0 : i32, i32
  }
  func.func @transform_10(%arg0: i32) -> (i32, i32, i32) {
    %c0_i32 = arith.constant 0 : i32
    %c0_i32_0 = arith.constant 0 : i32
    %c0_i32_1 = arith.constant 0 : i32
    return %arg0, %c0_i32, %c0_i32_0 : i32, i32, i32
  }
}

</mosaic_0001>

<bundles_post_ra>
// kernel: hin_forward.1
= control target key start
LH: loop header
LB: loop body
LE: loop exit
PB: predicated region body
PF: predicated region fallthrough
CT: control target
= control target key end

     0   :  { %s1217_s13 = smov 0   ;;  %s1536_s0 = inlined_call_operand.vmem [shape: f32[2,4,384], index: 0, kind: input, shape index: {}]   ;;  %s1537_s1 = inlined_call_operand.vmem [shape: f32[1,384], index: 1, kind: input, shape index: {}]   ;;  %s1538_s2 = inlined_call_operand.vmem [shape: f32[8,36], index: 2, kind: input, shape index: {}]   ;;  %s1539_s3 = inlined_call_operand.vmem [shape: f32[8,1], index: 3, kind: input, shape index: {}]   ;;  %s1540_s4 = inlined_call_operand.vmem [shape: f32[8,1], index: 4, kind: input, shape index: {}]   ;;  %s1541_s5 = inlined_call_operand.vmem [shape: f32[8,1], index: 5, kind: input, shape index: {}]   ;;  %s1542_s6 = inlined_call_operand.vmem [shape: f32[8,72], index: 6, kind: input, shape index: {}]   ;;  %s1543_s7 = inlined_call_operand.vmem [shape: f32[8,1], index: 7, kind: input, shape index: {}]   ;;  %s1544_s8 = inlined_call_operand.vmem [shape: f32[8,4], index: 8, kind: input, shape index: {}]   ;;  %s1545_s9 = inlined_call_operand.vmem [shape: f32[8,1], index: 9, kind: input, shape index: {}]   ;;  %s1546_s10 = inlined_call_operand.vmem [shape: f32[2,8,384], index: 10, kind: output, shape index: {}]  }
   0x1 LB: > { %s1022_s14 = sadd.s32 4294967295, %s1151_s13   ;;  %p1026_p0 = scmp.ge.s32.totalorder %s1151_s13, 1  ;;  %s1151_s13 = sphi %s1217_s13, %s20_s13  }
   0x2   : > { %p312_p1 = scmp.lt.s32.totalorder %s1151_s13, 3 }
   0x4   : > { %p313_p2 = pnand %p1026_p0, %p312_p1 }
   0x5   : > { %p350_p3 = scmp.lt.s32.totalorder (!%p313_p2), %s1022_s14, 1  ;;  %s1153_s19 = smov (!%p313_p2), 18  }
   0x6   : > { %316 = sbr.rel (%p313_p2) target bundleno = 932 (0x3a4), region = 60  ;;  %s1154_s20 = smov (!%p313_p2), 17  }
   0x7   : > { %s1155_s21 = smov (!%p313_p2), 1   ;;  %s1156_s22 = smov (!%p313_p2), 127  }
   0x8   : > { %s1157_s23 = smov (!%p313_p2), 111   ;;  %s1158_s24 = smov (!%p313_p2), 110  }
   0x9   : > { %s1159_s25 = smov (!%p313_p2), 109   ;;  %s1160_s26 = smov (!%p313_p2), 19  }
   0xb   : > { %s1548_s14 = smov (!%p350_p3, %s1022_s14), 1  ;;  %v380_v43 = vlaneseq  ;;  %v578_v46 = vld [vmem:[%s1539_s3] sm:$0xff]  ;;  %v1161_v47 = vmov 0   ;;  %vm564_vm4 = vcmask 1043456   ;;  %vm584_vm9 = vcmask 293888  }
   0xc   : > { %s1046_s15 = smul.u32 12, %s1548_s14  ;;  %1100 = vset.pattern.permute.xlu2 %v1161_v47  ;;  %1141 = vset.pattern.permute.xlu1 %v1161_v47  ;;  %v700_v63 = vld [vmem:[%s1540_s4] sm:$0xff]  ;;  %vm891_vm14 = vcmask 31744   ;;  %vm811_vm15 = vcmask 588800  }
   0xd   : > { %v1296_v45 = vand.u32 127, %v380_v43  ;;  %1142 = vset.pattern.permute.xlu0 %v1161_v47  ;;  %s1047_s27 = smul.u32 24, %s1548_s14 }
   0xe   : > { %s354_s18 = scalar_lea.vmem %s1536_s0, %s1046_s15 }
   0xf   : > { %v1231_v0 = vld [vmem:[%s354_s18] sm:$0xff]  ;;  %v1233_v1 = vld [vmem:[%s354_s18 + $0x8] sm:$0xf]  ;;  %vm458_vm0 = vcmp.lt.s32.totalorder %v1296_v45, 127  ;;  %vm439_vm1 = vcmp.lt.s32.totalorder %v1296_v45, 1  ;;  %vm496_vm2 = vcmp.lt.s32.totalorder %v1296_v45, 110  ;;  %s359_s30 = scalar_lea.vmem %s1546_s10, %s1047_s27 }
  0x10   : > { %365 = vst [vmem:[#allocation1] ss:$2 sm:$0xff] %v1231_v0  ;;  %vm477_vm3 = vcmp.lt.s32.totalorder %v1296_v45, 111  ;;  %vm515_vm5 = vcmp.lt.s32.totalorder %v1296_v45, 109  ;;  %vm420_vm6 = vcmp.lt.s32.totalorder %v1296_v45, 17  ;;  %vm401_vm7 = vcmp.lt.s32.totalorder %v1296_v45, 18 }
  0x11   : > { %367 = vst [vmem:[#allocation1 + $0x10] ss:$2 sm:$0xff] %v1233_v1  ;;  %vm382_vm8 = vcmp.lt.s32.totalorder %v1296_v45, 19 }
  0x17   : > { %v1237_v2 = vld.sshfl [vmem:[#allocation1] sm:$0xff pattern:$0x75316420]  ;;  %v1239_v3 = vld.sshfl [vmem:[#allocation1 + $0x8] sm:$0xff pattern:$0x75316420] }
  0x18   : > { %v1241_v4 = vld.sshfl [vmem:[#allocation1 + $0x10] sm:$0xff pattern:$0x75316420]  ;;  %386 = vst [vmem:[#allocation1] ss:$2 sm:$0xff] %v1231_v0 }
  0x19   : > { %388 = vst [vmem:[#allocation1 + $0x10] ss:$2 sm:$0xff] %v1233_v1  ;;  %v1095_v32 = vpack.i.bf16 %v1241_v4, %v1239_v3 }
  0x1f   : > { %v389_v5 = vld.sshfl [vmem:[#allocation1] sm:$0xff pattern:$0x75316420]  ;;  %v390_v6 = vld.sshfl [vmem:[#allocation1 + $0x8] sm:$0xff pattern:$0x75316420] }
  0x20   : > { %v391_v7 = vld.sshfl [vmem:[#allocation1 + $0x10] sm:$0xff pattern:$0x75316420]  ;;  %405 = vst [vmem:[#allocation1] ss:$2 sm:$0xff] %v1231_v0 }
  0x21   : > { %407 = vst [vmem:[#allocation1 + $0x10] ss:$2 sm:$0xff] %v1233_v1  ;;  %v1065_v8 = vpack.i.bf16 %v391_v7, %v390_v6 }
  0x23   : > { %1066 = vrot.lane.b32.xlu2 %v1065_v8, %s1153_s19 }
  0x27   : > { %v408_v9 = vld.sshfl [vmem:[#allocation1] sm:$0xff pattern:$0x75316420]  ;;  %v409_v10 = vld.sshfl [vmem:[#allocation1 + $0x8] sm:$0xff pattern:$0x75316420] }
  0x28   : > { %v410_v11 = vld.sshfl [vmem:[#allocation1 + $0x10] sm:$0xff pattern:$0x75316420]  ;;  %424 = vst [vmem:[#allocation1] ss:$2 sm:$0xff] %v1231_v0 }
  0x29   : > { %426 = vst [vmem:[#allocation1 + $0x10] ss:$2 sm:$0xff] %v1233_v1  ;;  %v1070_v12 = vpack.i.bf16 %v410_v11, %v409_v10 }
  0x2b   : > { %1071 = vrot.lane.b32.xlu0 %v1070_v12, %s1154_s20 }
  0x2f   : > { %v427_v13 = vld.sshfl [vmem:[#allocation1] sm:$0xff pattern:$0x75316420]  ;;  %v428_v14 = vld.sshfl [vmem:[#allocation1 + $0x8] sm:$0xff pattern:$0x75316420] }
  0x30   : > { %v429_v15 = vld.sshfl [vmem:[#allocation1 + $0x10] sm:$0xff pattern:$0x75316420]  ;;  %443 = vst [vmem:[#allocation1] ss:$2 sm:$0xff] %v1231_v0 }
  0x31   : > { %445 = vst [vmem:[#allocation1 + $0x10] ss:$2 sm:$0xff] %v1233_v1  ;;  %v1075_v16 = vpack.i.bf16 %v429_v15, %v428_v14 }
  0x33   : > { %1076 = vrot.lane.b32.xlu2 %v1075_v16, %s1155_s21 }
  0x37   : > { %v446_v17 = vld.sshfl [vmem:[#allocation1] sm:$0xff pattern:$0x75316420]  ;;  %v447_v18 = vld.sshfl [vmem:[#allocation1 + $0x8] sm:$0xff pattern:$0x75316420] }
  0x38   : > { %v448_v19 = vld.sshfl [vmem:[#allocation1 + $0x10] sm:$0xff pattern:$0x75316420]  ;;  %462 = vst [vmem:[#allocation1] ss:$2 sm:$0xff] %v1231_v0 }
  0x39   : > { %464 = vst [vmem:[#allocation1 + $0x10] ss:$2 sm:$0xff] %v1233_v1  ;;  %v1080_v20 = vpack.i.bf16 %v448_v19, %v446_v17 }
  0x3b   : > { %1081 = vrot.lane.b32.xlu1 %v1080_v20, %s1156_s22 }
  0x3f   : > { %v465_v21 = vld.sshfl [vmem:[#allocation1] sm:$0xff pattern:$0x75316420]  ;;  %v466_v22 = vld.sshfl [vmem:[#allocation1 + $0x8] sm:$0xff pattern:$0x75316420] }
  0x40   : > { %v467_v23 = vld.sshfl [vmem:[#allocation1 + $0x10] sm:$0xff pattern:$0x75316420]  ;;  %481 = vst [vmem:[#allocation1] ss:$2 sm:$0xff] %v1231_v0 }
  0x41   : > { %483 = vst [vmem:[#allocation1 + $0x10] ss:$2 sm:$0xff] %v1233_v1  ;;  %v1085_v24 = vpack.i.bf16 %v467_v23, %v465_v21 }
  0x43   : > { %454 = vrot.lane.b32.xlu1 %v447_v18, %s1156_s22  ;;  %1086 = vrot.lane.b32.xlu2 %v1085_v24, %s1157_s23 }
  0x47   : > { %v484_v25 = vld.sshfl [vmem:[#allocation1] sm:$0xff pattern:$0x75316420]  ;;  %v485_v26 = vld.sshfl [vmem:[#allocation1 + $0x8] sm:$0xff pattern:$0x75316420] }
  0x48   : > { %v486_v27 = vld.sshfl [vmem:[#allocation1 + $0x10] sm:$0xff pattern:$0x75316420]  ;;  %500 = vst [vmem:[#allocation1] ss:$2 sm:$0xff] %v1231_v0 }
  0x49   : > { %502 = vst [vmem:[#allocation1 + $0x10] ss:$2 sm:$0xff] %v1233_v1  ;;  %v1090_v28 = vpack.i.bf16 %v486_v27, %v484_v25 }
  0x4b   : > { %433 = vrot.lane.b32.xlu1 %v427_v13, %s1155_s21  ;;  %1091 = vrot.lane.b32.xlu0 %v1090_v28, %s1158_s24  ;;  %v709_v28 = vld [vmem:[%s1541_s5] sm:$0xff] }
  0x4c   : > { %473 = vrot.lane.b32.xlu2 %v466_v22, %s1157_s23 }
  0x4f   : > { %v504_v29 = vld.sshfl [vmem:[#allocation1 + $0x8] sm:$0xff pattern:$0x75316420]  ;;  %v503_v30 = vld.sshfl [vmem:[#allocation1] sm:$0xff pattern:$0x75316420] }
  0x50   : > { %v505_v31 = vld.sshfl [vmem:[#allocation1 + $0x10] sm:$0xff pattern:$0x75316420]  ;;  %537 = vst [vmem:[#allocation1] ss:$2 sm:$0xff] %v1231_v0 }
  0x51   : > { %539 = vst [vmem:[#allocation1 + $0x10] ss:$2 sm:$0xff] %v1233_v1 }
  0x53   : > { %513 = vrot.lane.b32.xlu1 %v505_v31, %s1159_s25  ;;  %492 = vrot.lane.b32.xlu0 %v485_v26, %s1158_s24 }
  0x54   : > { %395 = vrot.lane.b32.xlu2 %v389_v5, %s1153_s19 }
  0x57   : > { %v1279_v33 = vld.sshfl [vmem:[#allocation1] sm:$0xff pattern:$0x75316420]  ;;  %v1281_v34 = vld.sshfl [vmem:[#allocation1 + $0x8] sm:$0xff pattern:$0x75316420] }
  0x58   : > { %885 = vst [vmem:[#allocation1] ss:$2 sm:$0xff] %v1231_v0  ;;  %v1284_v35 = vld.sshfl [vmem:[#allocation1 + $0x10] sm:$0xff pattern:$0x75316420] }
  0x59   : > { %887 = vst [vmem:[#allocation1 + $0x10] ss:$2 sm:$0xff] %v1233_v1 }
  0x5b   : > { %511 = vrot.lane.b32.xlu1 %v504_v29, %s1159_s25  ;;  %509 = vrot.lane.b32.xlu0 %v503_v30, %s1159_s25 }
  0x5c   : > { %581 = vperm.xlu2 %1100, %v578_v46  }
  0x63   : > { %1096 = vrot.lane.b32.xlu0 %v1095_v32, %s1160_s26  ;;  %374 = vrot.lane.b32.xlu1 %v1237_v2, %s1160_s26 }
  0x64   : > { %703 = vperm.xlu2 %1100, %v700_v63  }
  0x6b   : > { %414 = vrot.lane.b32.xlu0 %v408_v9, %s1154_s20 }
  0x6c   : > { %712 = vperm.xlu2 %1100, %v709_v28  }
  0x7d   : > { %v1287_v37 = vpop.permute.xlu2 %1066 }
  0x7e   : > { %v1069_v19 = vunpack.i.h.bf16 %v1287_v37  ;;  %v1068_v20 = vunpack.i.l.bf16 %v1287_v37 }
  0x80   : > { %v402_v30 = vsel %vm401_vm7, %v1068_v20, %v1069_v19 }
  0x8d   : > { %v1291_v40 = vpop.permute.xlu2 %1076 }
  0x8e   : > { %v1079_v48 = vunpack.i.h.bf16 %v1291_v40  ;;  %v1078_v51 = vunpack.i.l.bf16 %v1291_v40 }
  0x90   : > { %v440_v62 = vsel %vm439_vm1, %v1078_v51, %v1079_v48 }
  0x91   : > { %v533_v24 = vrot.slane %v440_v62, 4 }
  0x9d   : > { %v1289_v38 = vpop.permute.xlu0 %1071  ;;  %v1087_v44 = vpop.permute.xlu2 %1086 }
  0x9e   : > { %v1089_v56 = vunpack.i.h.bf16 %v1087_v44  ;;  %v1088_v57 = vunpack.i.l.bf16 %v1087_v44  ;;  %v1074_v0 = vunpack.i.h.bf16 %v1289_v38  ;;  %v1073_v1 = vunpack.i.l.bf16 %v1289_v38  ;;  %v362_v38 = vld [vmem:[%s1537_s1] sm:$0x7] }
  0x9f   : > { %v658_v63 = vperm.slane %v362_v38, 0 }
  0xa0   : > { %v480_v6 = vsel %vm477_vm3, %v1089_v56, %v1088_v57  ;;  %v421_v27 = vsel %vm420_vm6, %v1073_v1, %v1074_v0 }
  0xa1   : > { %v570_v31 = vsel %vm564_vm4, %v421_v27, %v533_v24 }
  0xa6   : > { %v474_v3 = vpop.permute.xlu2 %473 }
  0xa7   : > { %v478_v9 = vsel %vm477_vm3, %v474_v3, %v1089_v56  ;;  %v479_v10 = vsel %vm477_vm3, %v1088_v57, %v474_v3 }
  0xad   : > { %v1082_v36 = vpop.permute.xlu1 %1081 }
  0xae   : > { %v1083_v52 = vunpack.i.l.bf16 %v1082_v36  ;;  %v1084_v55 = vunpack.i.h.bf16 %v1082_v36  ;;  %v524_v36 = vrot.slane %v402_v30, 4 }
  0xb0   : > { %v461_v7 = vsel %vm458_vm0, %v1084_v55, %v1083_v52 }
  0xb1   : > { %v551_v18 = vrot.slane %v461_v7, 4 }
  0xb3   : > { %v573_v29 = vsel %vm564_vm4, %v1284_v35, %v551_v18  ;;  %v577_v35 = vld [vmem:[%s1538_s2] sm:$0xff] }
  0xb5   : > { %v455_v39 = vpop.permute.xlu1 %454 }
  0xb6   : > { %v460_v60 = vsel %vm458_vm0, %v1083_v52, %v455_v39  ;;  %v459_v2 = vsel %vm458_vm0, %v455_v39, %v1084_v55  ;;  %v396_v39 = vpop.permute.xlu2 %395 }
  0xb7   : > { %v549_v8 = vrot.slane %v460_v60, 4  ;;  %v550_v14 = vrot.slane %v459_v2, 4 }
  0xb9   : > { %v571_v25 = vsel %vm564_vm4, %v1279_v33, %v549_v8  ;;  %v572_v26 = vsel %vm564_vm4, %v1281_v34, %v550_v14 }
  0xbd   : > { %v1293_v41 = vpop.permute.xlu1 %433  ;;  %v1092_v42 = vpop.permute.xlu0 %1091 }
  0xbe   : > { %v1094_v53 = vunpack.i.h.bf16 %v1092_v42  ;;  %v1093_v54 = vunpack.i.l.bf16 %v1092_v42  ;;  %v441_v44 = vsel %vm439_vm1, %v1293_v41, %v1078_v51  ;;  %v442_v46 = vsel %vm439_vm1, %v1079_v48, %v1293_v41  ;;  %v582_v62 = vpop.permute.xlu2 %581 }
  0xbf   : > { %v531_v52 = vrot.slane %v442_v46, 4 }
  0xc0   : > { %v499_v61 = vsel %vm496_vm2, %v1094_v53, %v1093_v54 }
  0xc1   : > { %v560_v13 = vrot.slane %v499_v61, 4 }
  0xc3   : > { %v576_v23 = vsel %vm564_vm4, %v480_v6, %v560_v13  ;;  %v660_v6 = vperm.slane %v362_v38, 2 }
  0xc5   : > { %v514_v49 = vpop.permute.xlu1 %513  ;;  %v493_v50 = vpop.permute.xlu0 %492 }
  0xc6   : > { %v497_v58 = vsel %vm496_vm2, %v493_v50, %v1094_v53  ;;  %v498_v59 = vsel %vm496_vm2, %v1093_v54, %v493_v50  ;;  %v404_v50 = vsel %vm401_vm7, %v1069_v19, %v396_v39  ;;  %v532_v53 = vrot.slane %v441_v44, 4 }
  0xc7   : > { %v558_v4 = vrot.slane %v498_v59, 4  ;;  %v559_v5 = vrot.slane %v497_v58, 4  ;;  %v522_v55 = vrot.slane %v404_v50, 4 }
  0xc9   : > { %v574_v21 = vsel %vm564_vm4, %v479_v10, %v558_v4  ;;  %v575_v22 = vsel %vm564_vm4, %v478_v9, %v559_v5 }
  0xcd   : > { %v512_v11 = vpop.permute.xlu1 %511  ;;  %v510_v12 = vpop.permute.xlu0 %509 }
  0xce   : > { %v517_v15 = vsel %vm515_vm5, %v510_v12, %v512_v11  ;;  %v516_v16 = vsel %vm515_vm5, %v512_v11, %v514_v49  ;;  %v518_v17 = vsel %vm515_vm5, %v514_v49, %v510_v12  ;;  %v403_v49 = vsel %vm401_vm7, %v396_v39, %v1068_v20 }
  0xcf   : > { %1029 = vmatpush.msk.msra.mxu0 %vm564_vm4, %v517_v15  ;;  %1031 = vmatpush.msk.msra.mxu1 %vm564_vm4, %v516_v16  ;;  %v523_v56 = vrot.slane %v403_v49, 4 }
  0xd0   : > { %1033 = vmatpush.msk.msra.mxu2 %vm564_vm4, %v518_v17 }
  0xd1   : > { %609 = vmatpush.msra.mxu0 %v574_v21  ;;  %629 = vmatpush.msra.mxu1 %v575_v22 }
  0xd2   : > { %649 = vmatpush.msra.mxu2 %v576_v23 }
  0xd3   : > { %610 = vmatpush.msra.mxu0 %v571_v25  ;;  %630 = vmatpush.msra.mxu1 %v572_v26 }
  0xd4   : > { %650 = vmatpush.msra.mxu2 %v573_v29 }
  0xd5   : > { %v1097_v32 = vpop.permute.xlu0 %1096  ;;  %v375_v47 = vpop.permute.xlu1 %374 }
  0xd6   : > { %651 = vmatpush.msra.mxu2 %v570_v31  ;;  %v1099_v33 = vunpack.i.h.bf16 %v1097_v32  ;;  %v1098_v34 = vunpack.i.l.bf16 %v1097_v32  ;;  %v704_v31 = vpop.permute.xlu2 %703 }
  0xd8   : > { %v383_v37 = vsel %vm382_vm8, %v1098_v34, %v1099_v33  ;;  %v384_v51 = vsel %vm382_vm8, %v375_v47, %v1098_v34  ;;  %v385_v40 = vsel %vm382_vm8, %v1099_v33, %v375_v47 }
  0xd9   : > { %v567_v42 = vsel %vm564_vm4, %v383_v37, %v524_v36  ;;  %v565_v59 = vsel %vm564_vm4, %v385_v40, %v522_v55  ;;  %v566_v60 = vsel %vm564_vm4, %v384_v51, %v523_v56  ;;  %v719_v36 = vshrl.u32 %v380_v43, 7 }
  0xda   : > { %652 = vmatpush.msra.mxu2 %v567_v42 }
  0xdb   : > { %1034 = vmatmul.msk.f32.vlgmr.msra.gmra.mxu2 %vm584_vm9, %v577_v35  ;;  %vm720_vm13 = vcmp.lt.s32.totalorder %v719_v36, 4 }
  0xdd   : > { %v415_v54 = vpop.permute.xlu0 %414 }
  0xde   : > { %v422_v41 = vsel %vm420_vm6, %v415_v54, %v1073_v1  ;;  %v423_v48 = vsel %vm420_vm6, %v1074_v0, %v415_v54  ;;  %v659_v0 = vperm.slane %v362_v38, 1  ;;  %v713_v49 = vpop.permute.xlu2 %712 }
  0xdf   : > { %v568_v57 = vsel %vm564_vm4, %v423_v48, %v531_v52  ;;  %v569_v58 = vsel %vm564_vm4, %v422_v41, %v532_v53 }
  0xe0   : > { %611 = vmatpush.msra.mxu0 %v568_v57  ;;  %631 = vmatpush.msra.mxu1 %v569_v58 }
  0xe2   : > { %612 = vmatpush.msra.mxu0 %v565_v59  ;;  %632 = vmatpush.msra.mxu1 %v566_v60 }
  0xe3   : > { %1030 = vmatmul.msk.f32.vlgmr.msra.gmra.mxu0 %vm584_vm9, %v577_v35  ;;  %1032 = vmatmul.msk.f32.vlgmr.msra.gmra.mxu1 %vm584_vm9, %v577_v35 }
 0x15e   : > { %v654_v61 = vpop.f32.mrf.mxu2 }
 0x15f   : > { %v655_v5 = vadd.f32 %v654_v61, %v582_v62 }
 0x160   : > { %v614_v1 = vpop.f32.mrf.mxu0  ;;  %v634_v2 = vpop.f32.mrf.mxu1 }
 0x161   : > { %v615_v3 = vadd.f32 %v614_v1, %v582_v62  ;;  %v635_v4 = vadd.f32 %v634_v2, %v582_v62  ;;  %v666_v9 = vmul.f32 %v660_v6, %v655_v5 }
 0x163   : > { %v664_v7 = vmul.f32 %v658_v63, %v615_v3  ;;  %v665_v8 = vmul.f32 %v659_v0, %v635_v4  ;;  %v888_v3 = vld.sshfl [vmem:[#allocation1] sm:$0xff pattern:$0x75316420] }
 0x164   : > { %1038 = vmatpush.msk.msrb.mxu2 %vm564_vm4, %v888_v3 }
 0x165   : > { %v667_v10 = vadd.f32 %v665_v8, %v664_v7 }
 0x167   : > { %v668_v11 = vadd.f32 %v667_v10, %v666_v9 }
 0x169   : > { %669 = vadd.xlane.f32.xlu0 %v668_v11 }
 0x1dc   : > { %v670_v12 = vpop.xlane.xlu0 %669 }
 0x1dd   : > { %v671_v13 = vmul.f32 0.00390625, %v670_v12 }
 0x1df   : > { %v672_v14 = vsub.f32 %v664_v7, %v671_v13  ;;  %v673_v15 = vsub.f32 %v665_v8, %v671_v13  ;;  %v674_v16 = vsub.f32 %v666_v9, %v671_v13 }
 0x1e1   : > { %v675_v17 = vmul.f32 %v672_v14, %v658_v63  ;;  %v676_v18 = vmul.f32 %v673_v15, %v659_v0  ;;  %v677_v19 = vmul.f32 %v674_v16, %v660_v6 }
 0x1e3   : > { %v678_v20 = vmul.f32 %v675_v17, %v675_v17  ;;  %v679_v21 = vmul.f32 %v676_v18, %v676_v18  ;;  %v680_v22 = vmul.f32 %v677_v19, %v677_v19 }
 0x1e5   : > { %v681_v23 = vadd.f32 %v679_v21, %v678_v20 }
 0x1e7   : > { %v682_v24 = vadd.f32 %v681_v23, %v680_v22 }
 0x1e9   : > { %683 = vadd.xlane.f32.xlu1 %v682_v24 }
 0x25c   : > { %v684_v25 = vpop.xlane.xlu1 %683 }
 0x25d   : > { %v685_v26 = vmul.f32 0.00390625, %v684_v25 }
 0x25f   : > { %v686_v27 = vadd.f32 1e-05, %v685_v26 }
 0x261   : > { %1143 = vrsqrt.f32 %v686_v27  ;;  %vm693_vm11 = vweird.f32 %v686_v27 }
 0x267   : > { %v1144_v28 = vpop.eup %1143 }
 0x268   : > { %v688_v29 = vmul.f32 %v1144_v28, %v686_v27  ;;  %vm694_vm10 = vweird.f32 %v1144_v28 }
 0x269   : > { %vm695_vm12 = vmor %vm693_vm11, %vm694_vm10 }
 0x26a   : > { %v689_v30 = vmul.f32 %v1144_v28, %v688_v29  ;;  %v879_v29 = vld [vmem:[%s1545_s9] sm:$0xff] }
 0x26c   : > { %v690_v32 = vmul.f32 0.5, %v689_v30 }
 0x26e   : > { %v691_v33 = vsub.f32 1.5, %v690_v32 }
 0x270   : > { %v692_v34 = vmul.f32 %v1144_v28, %v691_v33 }
 0x272   : > { %v696_v37 = vsel %vm695_vm12, %v1144_v28, %v692_v34  ;;  %v805_v28 = vld [vmem:[%s1543_s7] sm:$0xff] }
 0x273   : > { %v697_v35 = vmul.f32 %v696_v37, %v675_v17  ;;  %v698_v39 = vmul.f32 %v696_v37, %v676_v18  ;;  %v699_v42 = vmul.f32 %v696_v37, %v677_v19 }
 0x275   : > { %v706_v44 = vmul.f32 %v704_v31, %v697_v35  ;;  %v707_v46 = vmul.f32 %v704_v31, %v698_v39  ;;  %v708_v47 = vmul.f32 %v704_v31, %v699_v42 }
 0x277   : > { %v715_v50 = vadd.f32 %v713_v49, %v706_v44  ;;  %v716_v52 = vadd.f32 %v713_v49, %v707_v46  ;;  %v717_v53 = vadd.f32 %v713_v49, %v708_v47  ;;  %v804_v49 = vld [vmem:[%s1542_s6] sm:$0xff] }
 0x279   : > { %v723_v54 = vsel %vm720_vm13, %v715_v50, %v664_v7  ;;  %v724_v51 = vsel %vm720_vm13, %v716_v52, %v665_v8  ;;  %v725_v40 = vsel %vm720_vm13, %v717_v53, %v666_v9  ;;  %v1455_v8 = vld [vmem:[%s1544_s8] sm:$0xff]  ;;  %v889_v9 = vld.sshfl [vmem:[#allocation1 + $0x8] sm:$0xff pattern:$0x75316420] }
 0x27a   : > { %v726_v41 = vmax.f32 %v723_v54, 0.0  ;;  %v727_v48 = vmax.f32 %v724_v51, 0.0  ;;  %v728_v55 = vmax.f32 %v725_v40, 0.0  ;;  %1039 = vmatmul.msk.f32.vlgmr.msrb.gmra.mxu2 %vm891_vm14, %v1455_v8  ;;  %v890_v52 = vld.sshfl [vmem:[#allocation1 + $0x10] sm:$0xff pattern:$0x75316420] }
 0x27b   : > { %1040 = vmatpush.msk.msra.mxu2 %vm564_vm4, %v889_v9 }
 0x27c   : > { %v729_v56 = vmul.f32 %v726_v41, %v658_v63  ;;  %v1415_v43 = vmul.f32 %v727_v48, %v659_v0  ;;  %v1417_v57 = vmul.f32 %v728_v55, %v660_v6 }
 0x27e   : > { %v1126_v58 = vpack.i.bf16 %v1417_v57, %v729_v56  ;;  %v1101_v59 = vpack.i.bf16 %v1415_v43, %v729_v56 }
 0x280   : > { %1127 = vrot.lane.b32.xlu1 %v1126_v58, %s1154_s20  ;;  %1122 = vrot.lane.b32.xlu0 %v1126_v58, %s1155_s21 }
 0x281   : > { %1102 = vrot.lane.b32.xlu2 %v1101_v59, %s1159_s25 }
 0x282   : > { %1041 = vmatmul.msk.f32.vlgmr.msra.gmra.mxu2 %vm891_vm14, %v1455_v8 }
 0x288   : > { %781 = vrot.lane.b32.xlu1 %v1417_v57, %s1157_s23  ;;  %790 = vrot.lane.b32.xlu0 %v1417_v57, %s1158_s24 }
 0x289   : > { %1107 = vrot.lane.b32.xlu2 %v1101_v59, %s1158_s24 }
 0x290   : > { %752 = vrot.lane.b32.xlu1 %v1415_v43, %s1154_s20  ;;  %772 = vrot.lane.b32.xlu0 %v1417_v57, %s1156_s22 }
 0x291   : > { %1112 = vrot.lane.b32.xlu2 %v1101_v59, %s1157_s23 }
 0x298   : > { %743 = vrot.lane.b32.xlu0 %v1415_v43, %s1153_s19  ;;  %808 = vperm.xlu1 %1141, %v805_v28  }
 0x299   : > { %1117 = vrot.lane.b32.xlu2 %v1101_v59, %s1156_s22 }
 0x2a0   : > { %882 = vperm.xlu0 %1142, %v879_v29  }
 0x2a1   : > { %799 = vrot.lane.b32.xlu2 %v1417_v57, %s1159_s25 }
 0x2a9   : > { %1132 = vrot.lane.b32.xlu2 %v1126_v58, %s1153_s19 }
 0x2b1   : > { %1137 = vrot.lane.b32.xlu2 %v1126_v58, %s1160_s26 }
 0x2b9   : > { %761 = vrot.lane.b32.xlu2 %v1415_v43, %s1155_s21 }
 0x2c1   : > { %734 = vrot.lane.b32.xlu2 %v1415_v43, %s1160_s26 }
 0x2db   : > { %v1103_v60 = vpop.permute.xlu2 %1102 }
 0x2dc   : > { %v1105_v38 = vunpack.i.h.bf16 %v1103_v60  ;;  %v1104_v61 = vunpack.i.l.bf16 %v1103_v60 }
 0x2de   : > { %v802_v62 = vsel %vm515_vm5, %v1104_v61, %v1105_v38 }
 0x2df   : > { %822 = vmatpush.msra.mxu3 %v802_v62 }
 0x2e3   : > { %v1108_v63 = vpop.permute.xlu2 %1107 }
 0x2e4   : > { %v1110_v0 = vunpack.i.h.bf16 %v1108_v63  ;;  %v1109_v1 = vunpack.i.l.bf16 %v1108_v63 }
 0x2e6   : > { %v793_v2 = vsel %vm496_vm2, %v1109_v1, %v1110_v0 }
 0x2e7   : > { %823 = vmatpush.msra.mxu3 %v793_v2 }
 0x2eb   : > { %v1113_v4 = vpop.permute.xlu2 %1112 }
 0x2ec   : > { %v1115_v5 = vunpack.i.h.bf16 %v1113_v4  ;;  %v1114_v6 = vunpack.i.l.bf16 %v1113_v4 }
 0x2ee   : > { %v784_v7 = vsel %vm477_vm3, %v1114_v6, %v1115_v5 }
 0x2ef   : > { %824 = vmatpush.msra.mxu3 %v784_v7 }
 0x2f2   : > { %v1459_v10 = vpop.permute.xlu0 %1122  ;;  %v1462_v11 = vpop.permute.xlu1 %1127 }
 0x2f3   : > { %v1118_v12 = vpop.permute.xlu2 %1117  ;;  %v1125_v15 = vunpack.i.h.bf16 %v1459_v10  ;;  %v1124_v16 = vunpack.i.l.bf16 %v1459_v10  ;;  %v1130_v18 = vunpack.i.h.bf16 %v1462_v11  ;;  %v1129_v19 = vunpack.i.l.bf16 %v1462_v11 }
 0x2f4   : > { %v1120_v13 = vunpack.i.h.bf16 %v1118_v12  ;;  %v1119_v14 = vunpack.i.l.bf16 %v1118_v12 }
 0x2f5   : > { %v767_v21 = vsel %vm439_vm1, %v1125_v15, %v1124_v16  ;;  %v758_v23 = vsel %vm420_vm6, %v1130_v18, %v1129_v19 }
 0x2f6   : > { %v775_v17 = vsel %vm458_vm0, %v1119_v14, %v1120_v13 }
 0x2f7   : > { %825 = vmatpush.msra.mxu3 %v775_v17 }
 0x2f9   : > { %826 = vmatpush.msra.mxu3 %v729_v56 }
 0x2fa   : > { %v791_v20 = vpop.permute.xlu0 %790  ;;  %v782_v26 = vpop.permute.xlu1 %781 }
 0x2fb   : > { %v800_v22 = vpop.permute.xlu2 %799  ;;  %827 = vmatpush.msra.mxu3 %v767_v21  ;;  %v792_v27 = vsel %vm496_vm2, %v1110_v0, %v791_v20  ;;  %v794_v30 = vsel %vm496_vm2, %v791_v20, %v1109_v1  ;;  %v783_v31 = vsel %vm477_vm3, %v1115_v5, %v782_v26  ;;  %v785_v32 = vsel %vm477_vm3, %v782_v26, %v1114_v6 }
 0x2fc   : > { %v801_v24 = vsel %vm515_vm5, %v1105_v38, %v800_v22  ;;  %v803_v25 = vsel %vm515_vm5, %v800_v22, %v1104_v61 }
 0x2fd   : > { %828 = vmatpush.msra.mxu3 %v758_v23  ;;  %842 = vmatpush.msrb.mxu0 %v801_v24  ;;  %v918_v60 = vpop.f32.mrf.mxu2 }
 0x2fe   : > { %862 = vmatpush.msrb.mxu1 %v803_v25 }
 0x2ff   : > { %843 = vmatpush.msrb.mxu0 %v792_v27 }
 0x300   : > { %863 = vmatpush.msrb.mxu1 %v794_v30 }
 0x301   : > { %844 = vmatpush.msrb.mxu0 %v783_v31 }
 0x302   : > { %864 = vmatpush.msrb.mxu1 %v785_v32  ;;  %v773_v33 = vpop.permute.xlu0 %772  ;;  %v753_v53 = vpop.permute.xlu1 %752 }
 0x303   : > { %v1133_v34 = vpop.permute.xlu2 %1132  ;;  %v774_v36 = vsel %vm458_vm0, %v1120_v13, %v773_v33  ;;  %v776_v37 = vsel %vm458_vm0, %v773_v33, %v1119_v14  ;;  %v757_v48 = vsel %vm420_vm6, %v1129_v19, %v753_v53  ;;  %v756_v55 = vsel %vm420_vm6, %v753_v53, %v1130_v18 }
 0x304   : > { %v1135_v35 = vunpack.i.h.bf16 %v1133_v34  ;;  %v1134_v39 = vunpack.i.l.bf16 %v1133_v34  ;;  %845 = vmatpush.msrb.mxu0 %v774_v36  ;;  %865 = vmatpush.msrb.mxu1 %v776_v37 }
 0x305   : > { %v938_v2 = vpop.f32.mrf.mxu2 }
 0x306   : > { %v749_v42 = vsel %vm401_vm7, %v1135_v35, %v1134_v39  ;;  %846 = vmatpush.msrb.mxu0 %v1415_v43  ;;  %866 = vmatpush.msrb.mxu1 %v1417_v57 }
 0x307   : > { %829 = vmatpush.msra.mxu3 %v749_v42 }
 0x30a   : > { %v744_v41 = vpop.permute.xlu0 %743  ;;  %v809_v38 = vpop.permute.xlu1 %808 }
 0x30b   : > { %v1138_v44 = vpop.permute.xlu2 %1137  ;;  %v748_v56 = vsel %vm401_vm7, %v1134_v39, %v744_v41  ;;  %v747_v43 = vsel %vm401_vm7, %v744_v41, %v1135_v35 }
 0x30c   : > { %v1140_v46 = vunpack.i.h.bf16 %v1138_v44  ;;  %v1139_v47 = vunpack.i.l.bf16 %v1138_v44 }
 0x30e   : > { %v740_v50 = vsel %vm382_vm8, %v1140_v46, %v1139_v47 }
 0x30f   : > { %830 = vmatpush.msra.mxu3 %v740_v50 }
 0x310   : > { %1035 = vmatmul.msk.f32.vlgmr.msra.gmra.mxu3 %vm811_vm15, %v804_v49 }
 0x311   : > { %1042 = vmatpush.msk.msrb.mxu3 %vm564_vm4, %v890_v52 }
 0x312   : > { %v883_v61 = vpop.permute.xlu0 %882 }
 0x313   : > { %v762_v54 = vpop.permute.xlu2 %761  ;;  %v919_v0 = vadd.f32 %v918_v60, %v883_v61  ;;  %v939_v7 = vadd.f32 %v938_v2, %v883_v61 }
 0x314   : > { %v766_v51 = vsel %vm439_vm1, %v1124_v16, %v762_v54  ;;  %v765_v40 = vsel %vm439_vm1, %v762_v54, %v1125_v15 }
 0x315   : > { %847 = vmatpush.msrb.mxu0 %v766_v51  ;;  %867 = vmatpush.msrb.mxu1 %v765_v40 }
 0x317   : > { %848 = vmatpush.msrb.mxu0 %v757_v48  ;;  %868 = vmatpush.msrb.mxu1 %v756_v55 }
 0x318   : > { %1043 = vmatmul.msk.f32.vlgmr.msrb.gmra.mxu3 %vm891_vm14, %v1455_v8 }
 0x319   : > { %849 = vmatpush.msrb.mxu0 %v748_v56  ;;  %869 = vmatpush.msrb.mxu1 %v747_v43 }
 0x31b   : > { %v735_v57 = vpop.permute.xlu2 %734 }
 0x31c   : > { %v739_v58 = vsel %vm382_vm8, %v1139_v47, %v735_v57  ;;  %v738_v59 = vsel %vm382_vm8, %v735_v57, %v1140_v46 }
 0x31d   : > { %850 = vmatpush.msrb.mxu0 %v739_v58  ;;  %870 = vmatpush.msrb.mxu1 %v738_v59 }
 0x31e   : > { %1036 = vmatmul.msk.f32.vlgmr.msrb.gmra.mxu0 %vm811_vm15, %v804_v49  ;;  %1037 = vmatmul.msk.f32.vlgmr.msrb.gmra.mxu1 %vm811_vm15, %v804_v49 }
 0x393   : > { %v832_v62 = vpop.f32.mrf.mxu3 }
 0x394   : > { %v833_v63 = vadd.f32 %v832_v62, %v809_v38 }
 0x396   : > { %v875_v1 = vmax.f32 %v833_v63, 0.0 }
 0x398   : > { %v961_v45 = vadd.f32 %v919_v0, %v875_v1 }
 0x39a   : > { %964 = vst [vmem:[%s359_s30] sm:$0xff] %v961_v45 }
 0x39b   : > { %v852_v3 = vpop.f32.mrf.mxu0  ;;  %v872_v4 = vpop.f32.mrf.mxu1 }
 0x39c   : > { %v853_v5 = vadd.f32 %v852_v3, %v809_v38  ;;  %v873_v6 = vadd.f32 %v872_v4, %v809_v38  ;;  %v958_v8 = vpop.f32.mrf.mxu3 }
 0x39d   : > { %v959_v9 = vadd.f32 %v958_v8, %v883_v61 }
 0x39e   : > { %v876_v10 = vmax.f32 %v853_v5, 0.0  ;;  %v877_v11 = vmax.f32 %v873_v6, 0.0 }
 0x3a0   : > { %v962_v12 = vadd.f32 %v939_v7, %v876_v10  ;;  %v963_v13 = vadd.f32 %v959_v9, %v877_v11 }
 0x3a2   : > { %965 = vst [vmem:[%s359_s30 + $0x8] sm:$0xff] %v962_v12 }
 0x3a3   : > { %966 = vst [vmem:[%s359_s30 + $0x10] sm:$0xff] %v963_v13 }
 0x3a4 PF: > { %s20_s13 = sadd.s32 1, %s1151_s13  }
 0x3a5   : > { %p17_p4 = scmp.ge.s32.totalorder %s20_s13, 4  }
 0x3a7   :  { %19 = sbr.rel (!%p17_p4) target bundleno = 1 (0x1), region = 100 }

</bundles_post_ra>
